<compile_context>
chip_gen: v7x
topology: tpu7x:2x2x1
jax: 0.10.0
libtpu: 0.0.40
codegen_flags: <defaults>
</compile_context>

<pallas_src>
import numpy as np
import jax
import jax.numpy as jnp
from jax.experimental import pallas as pl
from jax.experimental.pallas import tpu as pltpu


# ----------------------------------------------------------------------------
# Fused forward builder
# ----------------------------------------------------------------------------
def build_fused_forward(config, B, T):
    input_dim = config["input_dim"]
    hidden_dims = list(config["hidden_dim"])
    K = config["kernel_size"]
    n_blocks = len(hidden_dims)
    dims_in = [input_dim] + hidden_dims[:-1]
    dims_out = list(hidden_dims)
    dilations = [2 ** i for i in range(n_blocks)]
    has_ds = [dims_in[i] != dims_out[i] for i in range(n_blocks)]
    H = hidden_dims[-1]

    # ---- static layout of the packed weight slab: (R_total, C_max) f32 ----
    C_max = max(dims_out + [H])
    layout = []                              # (name, rows, cols), fixed order
    for i in range(n_blocks):
        ci, co = dims_in[i], dims_out[i]
        layout += [(f"w1_{i}", K * ci, co), (f"b1_{i}", 1, co),
                   (f"w2_{i}", K * co, co), (f"b2_{i}", 1, co)]
        if has_ds[i]:
            layout += [(f"wd_{i}", ci, co), (f"bd_{i}", 1, co)]
    layout += [("l1w", H, H), ("l1b", 1, H), ("l2w", H, H), ("l2b", 1, H)]

    offsets = {}
    off = 0
    for name, r, c in layout:
        offsets[name] = (off, r, c)
        off += r
    R_total = off

    # ------------------------------------------------------------------ kernel
    def kernel(x_ref, w_ref, out_ref):
        # x_ref: (T, Cin0)  w_ref: (R_total, C_max)  out_ref: (T, H)
        def wslice(name):
            o, r, c = offsets[name]
            return w_ref[o:o + r, 0:c].astype(jnp.float32)   # static slice

        # time index within this sequence, for causal zero-pad masking
        t_idx = jax.lax.broadcasted_iota(jnp.int32, (T, 1), 0)

        def shift(h, s):
            # causal shift: y[t] = h[t - s] for t >= s, else 0 (== left pad + chomp)
            if s == 0:
                return h
            rolled = pltpu.roll(h, s, 0)                      # XLU sublane roll
            return jnp.where(t_idx >= s, rolled, 0.0)         # VPU mask

        def causal_conv(h, d, w_name, b_name):
            # fuse all K dilated taps into ONE matmul
            parts = [shift(h, (K - 1 - j) * d) for j in range(K)]
            h_cat = jnp.concatenate(parts, axis=-1)           # (T, K*Cin)
            z = jnp.dot(h_cat, wslice(w_name),
                        preferred_element_type=jnp.float32) + wslice(b_name)
            return jnp.maximum(z, 0.0)                        # ReLU

        h = x_ref[...].astype(jnp.float32)                    # (T, Cin0)
        for i in range(n_blocks):
            d = dilations[i]
            # net: conv1 -> chomp -> ReLU -> (dropout) -> conv2 -> chomp -> ReLU
            h1 = causal_conv(h, d, f"w1_{i}", f"b1_{i}")
            h2 = causal_conv(h1, d, f"w2_{i}", f"b2_{i}")
            if has_ds[i]:                                     # 1x1 downsample conv
                res = (jnp.dot(h, wslice(f"wd_{i}"),
                               preferred_element_type=jnp.float32)
                       + wslice(f"bd_{i}"))
            else:
                res = h
            h = jnp.maximum(h2 + res, 0.0)                    # residual add + ReLU

        # MLP head: l2(LeakyReLU(l1(h)))
        z = jnp.dot(h, wslice("l1w"),
                    preferred_element_type=jnp.float32) + wslice("l1b")
        z = jnp.where(z > 0, z, 0.01 * z)                     # LeakyReLU(0.01)
        o = jnp.dot(z, wslice("l2w"),
                    preferred_element_type=jnp.float32) + wslice("l2b")
        out_ref[...] = o.astype(out_ref.dtype)

    # ------------------------------------------------- host-side weight packing
    def pack_params(params):
        def pad_cols(m):
            m = jnp.asarray(m, jnp.float32)
            if m.shape[1] < C_max:
                m = jnp.pad(m, ((0, 0), (0, C_max - m.shape[1])))
            return m

        pieces = {}
        for i, blk in enumerate(params["blocks"]):
            ci, co = dims_in[i], dims_out[i]
            pieces[f"w1_{i}"] = blk["w1"].reshape(K * ci, co)   # tap-major rows
            pieces[f"b1_{i}"] = blk["b1"].reshape(1, co)
            pieces[f"w2_{i}"] = blk["w2"].reshape(K * co, co)
            pieces[f"b2_{i}"] = blk["b2"].reshape(1, co)
            if has_ds[i]:
                pieces[f"wd_{i}"] = blk["wd"].reshape(ci, co)
                pieces[f"bd_{i}"] = blk["bd"].reshape(1, co)
        pieces["l1w"] = params["l1_w"]
        pieces["l1b"] = params["l1_b"].reshape(1, H)
        pieces["l2w"] = params["l2_w"]
        pieces["l2b"] = params["l2_b"].reshape(1, H)
        return jnp.concatenate([pad_cols(pieces[n]) for n, _, _ in layout], axis=0)

    # ----------------------------------------------------------------- wrapper
    def forward(x, params):
        w_slab = pack_params(params)                          # (R_total, C_max)
        out = pl.pallas_call(
            kernel,
            grid=(B,),                                        # one batch per step
            in_specs=[
                pl.BlockSpec((None, T, input_dim), lambda b: (b, 0, 0)),
                pl.BlockSpec((R_total, C_max), lambda b: (0, 0)),   # stays resident
            ],
            out_specs=pl.BlockSpec((None, T, H), lambda b: (b, 0, 0)),
            out_shape=jax.ShapeDtypeStruct((B, T, H), x.dtype),
            compiler_params=pltpu.CompilerParams(
                dimension_semantics=("parallel",)),           # 2 TCs on v7x
        )(x, w_slab)
        return out

    return forward


# ----------------------------------------------------------------------------
# Parameter construction (mirrors init_weights(): conv weights ~ N(0, 0.01))
# ----------------------------------------------------------------------------
def init_params(key, config):
    input_dim = config["input_dim"]
    hidden_dims = config["hidden_dim"]
    K = config["kernel_size"]

    params = {"blocks": []}
    for i, out_c in enumerate(hidden_dims):
        in_c = input_dim if i == 0 else hidden_dims[i - 1]
        key, k1, k2, k3, k4, k5, k6 = jax.random.split(key, 7)
        blk = {
            "w1": 0.01 * jax.random.normal(k1, (K, in_c, out_c), jnp.float32),
            "b1": 0.01 * jax.random.normal(k2, (out_c,), jnp.float32),
            "w2": 0.01 * jax.random.normal(k3, (K, out_c, out_c), jnp.float32),
            "b2": 0.01 * jax.random.normal(k4, (out_c,), jnp.float32),
        }
        if in_c != out_c:  # 1x1 downsample conv for the residual path
            blk["wd"] = 0.01 * jax.random.normal(k5, (1, in_c, out_c), jnp.float32)
            blk["bd"] = 0.01 * jax.random.normal(k6, (out_c,), jnp.float32)
        params["blocks"].append(blk)

    H = hidden_dims[-1]
    key, k1, k2, k3, k4 = jax.random.split(key, 5)
    s = 1.0 / jnp.sqrt(H)
    params["l1_w"] = s * jax.random.normal(k1, (H, H), jnp.float32)  # (in, out)
    params["l1_b"] = s * jax.random.normal(k2, (H,), jnp.float32)
    params["l2_w"] = s * jax.random.normal(k3, (H, H), jnp.float32)
    params["l2_b"] = s * jax.random.normal(k4, (H,), jnp.float32)
    return params


# ----------------------------------------------------------------------------
# Pure-JAX reference (causal dilated TCN + head), for a correctness check
# ----------------------------------------------------------------------------
def reference_forward(x, params, config):
    K = config["kernel_size"]
    hi = jax.lax.Precision.HIGHEST
    h = x                                                   # (B, T, C)
    for i, blk in enumerate(params["blocks"]):
        d = 2 ** i
        T_ = h.shape[1]

        def conv(z, w, b):
            zp = jnp.pad(z, ((0, 0), ((K - 1) * d, 0), (0, 0)))   # causal left pad
            out = sum(jnp.einsum("btc,co->bto", zp[:, j * d:j * d + T_, :],
                                 w[j], precision=hi) for j in range(K))
            return out + b

        h1 = jax.nn.relu(conv(h, blk["w1"], blk["b1"]))
        h2 = jax.nn.relu(conv(h1, blk["w2"], blk["b2"]))
        if "wd" in blk:
            res = jnp.einsum("btc,co->bto", h, blk["wd"][0], precision=hi) + blk["bd"]
        else:
            res = h
        h = jax.nn.relu(h2 + res)

    z = jnp.dot(h, params["l1_w"], precision=hi) + params["l1_b"]
    z = jnp.where(z > 0, z, 0.01 * z)                       # LeakyReLU(0.01)
    return jnp.dot(z, params["l2_w"], precision=hi) + params["l2_b"]


# ----------------------------------------------------------------------------
if __name__ == "__main__":
    config = {
        "input_dim": 4,
        "hidden_dim": [8, 8],
        "kernel_size": 3,
        "tcn_bias": True,
        "dropout": 0.2,   # identity at inference
    }
    B, T = 2, 16

    key = jax.random.PRNGKey(0)
    key, xkey = jax.random.split(key)
    x = jax.random.normal(xkey, (B, T, config["input_dim"]), jnp.float32)
    params = init_params(key, config)

    forward = jax.jit(build_fused_forward(config, B, T))
    out = forward(x, params)
    out = jax.block_until_ready(out)
    assert out.shape == (B, T, config["hidden_dim"][-1])

    ref = reference_forward(x, params, config)
    np.testing.assert_allclose(np.asarray(out), np.asarray(ref),
                               rtol=1e-3, atol=1e-4)
    print("KERNEL_OK")
</pallas_src>

<mosaic_0001>
module attributes {stable_mosaic.version = 11 : i64} {
  func.func @kernel(%arg0: i32, %arg1: memref<1x16x4xf32, #tpu.memory_space<vmem>>, %arg2: memref<111x8xf32, #tpu.memory_space<vmem>>, %arg3: memref<1x16x8xf32, #tpu.memory_space<vmem>>) attributes {dimension_semantics = [#tpu.dimension_semantics<parallel>], iteration_bounds = array<i64: 2>, scalar_prefetch = 0 : i64, scratch_operands = 0 : i64, tpu.core_type = #tpu.core_type<tc>, window_params = [{transform_indices = @transform_0, window_bounds = array<i64: 1, 16, 4>}, {pipeline_mode = #tpu.pipeline_mode<synchronous>, transform_indices = @transform_1, window_bounds = array<i64: 111, 8>}, {transform_indices = @transform_2, window_bounds = array<i64: 1, 16, 8>}]} {
    %0 = tpu.iota {dimensions = array<i32: 0>} : vector<16x1xi32>
    %c0 = arith.constant 0 : index
    %c0_0 = arith.constant 0 : index
    %c0_1 = arith.constant 0 : index
    %1 = vector.load %arg1[%c0, %c0_0, %c0_1] : memref<1x16x4xf32, #tpu.memory_space<vmem>>, vector<1x16x4xf32>
    %2 = vector.shape_cast %1 : vector<1x16x4xf32> to vector<16x4xf32>
    %c2_i32 = arith.constant 2 : i32
    %3 = tpu.dynamic_rotate %2 by %c2_i32 dim 0 : vector<16x4xf32>, i32 -> vector<16x4xf32>
    %c2_i32_2 = arith.constant 2 : i32
    %4 = vector.broadcast %c2_i32_2 : i32 to vector<16x1xi32>
    %5 = arith.cmpi sge, %0, %4 : vector<16x1xi32>
    %cst = arith.constant 0.000000e+00 : f32
    %6 = vector.shape_cast %5 : vector<16x1xi1> to vector<16x1xi1>
    %7 = vector.broadcast %6 : vector<16x1xi1> to vector<16x4xi1>
    %8 = vector.broadcast %cst : f32 to vector<16x4xf32>
    %9 = arith.select %7, %3, %8 : vector<16x4xi1>, vector<16x4xf32>
    %c1_i32 = arith.constant 1 : i32
    %10 = tpu.dynamic_rotate %2 by %c1_i32 dim 0 : vector<16x4xf32>, i32 -> vector<16x4xf32>
    %c1_i32_3 = arith.constant 1 : i32
    %11 = vector.broadcast %c1_i32_3 : i32 to vector<16x1xi32>
    %12 = arith.cmpi sge, %0, %11 : vector<16x1xi32>
    %cst_4 = arith.constant 0.000000e+00 : f32
    %13 = vector.shape_cast %12 : vector<16x1xi1> to vector<16x1xi1>
    %14 = vector.broadcast %13 : vector<16x1xi1> to vector<16x4xi1>
    %15 = vector.broadcast %cst_4 : f32 to vector<16x4xf32>
    %16 = arith.select %14, %10, %15 : vector<16x4xi1>, vector<16x4xf32>
    %17 = tpu.concatenate %9, %16, %2 in 1 : vector<16x4xf32>, vector<16x4xf32>, vector<16x4xf32> -> vector<16x12xf32>
    %c0_5 = arith.constant 0 : index
    %c0_6 = arith.constant 0 : index
    %18 = vector.load %arg2[%c0_5, %c0_6] : memref<111x8xf32, #tpu.memory_space<vmem>>, vector<12x8xf32>
    %cst_7 = arith.constant dense<0.000000e+00> : vector<16x8xf32>
    %19 = tpu.matmul %17, %18, %cst_7 {dimension_numbers = #tpu.dot_dimension_numbers<[1], [0], [0], [1], [0, 0, 1, 1], [], []>} : vector<16x12xf32>, vector<12x8xf32>, vector<16x8xf32> -> vector<16x8xf32>
    %c12 = arith.constant 12 : index
    %c0_8 = arith.constant 0 : index
    %20 = vector.load %arg2[%c12, %c0_8] : memref<111x8xf32, #tpu.memory_space<vmem>>, vector<1x8xf32>
    %21 = vector.broadcast %20 : vector<1x8xf32> to vector<16x8xf32>
    %22 = arith.addf %19, %21 : vector<16x8xf32>
    %cst_9 = arith.constant 0.000000e+00 : f32
    %23 = vector.broadcast %cst_9 : f32 to vector<16x8xf32>
    %24 = arith.maximumf %22, %23 : vector<16x8xf32>
    %c2_i32_10 = arith.constant 2 : i32
    %25 = tpu.dynamic_rotate %24 by %c2_i32_10 dim 0 : vector<16x8xf32>, i32 -> vector<16x8xf32>
    %c2_i32_11 = arith.constant 2 : i32
    %26 = vector.broadcast %c2_i32_11 : i32 to vector<16x1xi32>
    %27 = arith.cmpi sge, %0, %26 : vector<16x1xi32>
    %cst_12 = arith.constant 0.000000e+00 : f32
    %28 = vector.shape_cast %27 : vector<16x1xi1> to vector<16x1xi1>
    %29 = vector.broadcast %28 : vector<16x1xi1> to vector<16x8xi1>
    %30 = vector.broadcast %cst_12 : f32 to vector<16x8xf32>
    %31 = arith.select %29, %25, %30 : vector<16x8xi1>, vector<16x8xf32>
    %c1_i32_13 = arith.constant 1 : i32
    %32 = tpu.dynamic_rotate %24 by %c1_i32_13 dim 0 : vector<16x8xf32>, i32 -> vector<16x8xf32>
    %c1_i32_14 = arith.constant 1 : i32
    %33 = vector.broadcast %c1_i32_14 : i32 to vector<16x1xi32>
    %34 = arith.cmpi sge, %0, %33 : vector<16x1xi32>
    %cst_15 = arith.constant 0.000000e+00 : f32
    %35 = vector.shape_cast %34 : vector<16x1xi1> to vector<16x1xi1>
    %36 = vector.broadcast %35 : vector<16x1xi1> to vector<16x8xi1>
    %37 = vector.broadcast %cst_15 : f32 to vector<16x8xf32>
    %38 = arith.select %36, %32, %37 : vector<16x8xi1>, vector<16x8xf32>
    %39 = tpu.concatenate %31, %38, %24 in 1 : vector<16x8xf32>, vector<16x8xf32>, vector<16x8xf32> -> vector<16x24xf32>
    %c13 = arith.constant 13 : index
    %c0_16 = arith.constant 0 : index
    %40 = vector.load %arg2[%c13, %c0_16] : memref<111x8xf32, #tpu.memory_space<vmem>>, vector<24x8xf32>
    %cst_17 = arith.constant dense<0.000000e+00> : vector<16x8xf32>
    %41 = tpu.matmul %39, %40, %cst_17 {dimension_numbers = #tpu.dot_dimension_numbers<[1], [0], [0], [1], [0, 0, 1, 1], [], []>} : vector<16x24xf32>, vector<24x8xf32>, vector<16x8xf32> -> vector<16x8xf32>
    %c37 = arith.constant 37 : index
    %c0_18 = arith.constant 0 : index
    %42 = vector.load %arg2[%c37, %c0_18] : memref<111x8xf32, #tpu.memory_space<vmem>>, vector<1x8xf32>
    %43 = vector.broadcast %42 : vector<1x8xf32> to vector<16x8xf32>
    %44 = arith.addf %41, %43 : vector<16x8xf32>
    %cst_19 = arith.constant 0.000000e+00 : f32
    %45 = vector.broadcast %cst_19 : f32 to vector<16x8xf32>
    %46 = arith.maximumf %44, %45 : vector<16x8xf32>
    %c38 = arith.constant 38 : index
    %c0_20 = arith.constant 0 : index
    %47 = vector.load %arg2[%c38, %c0_20] : memref<111x8xf32, #tpu.memory_space<vmem>>, vector<4x8xf32>
    %cst_21 = arith.constant dense<0.000000e+00> : vector<16x8xf32>
    %48 = tpu.matmul %2, %47, %cst_21 {dimension_numbers = #tpu.dot_dimension_numbers<[1], [0], [0], [1], [0, 0, 1, 1], [], []>} : vector<16x4xf32>, vector<4x8xf32>, vector<16x8xf32> -> vector<16x8xf32>
    %c42 = arith.constant 42 : index
    %c0_22 = arith.constant 0 : index
    %49 = vector.load %arg2[%c42, %c0_22] : memref<111x8xf32, #tpu.memory_space<vmem>>, vector<1x8xf32>
    %50 = vector.broadcast %49 : vector<1x8xf32> to vector<16x8xf32>
    %51 = arith.addf %48, %50 : vector<16x8xf32>
    %52 = arith.addf %46, %51 : vector<16x8xf32>
    %cst_23 = arith.constant 0.000000e+00 : f32
    %53 = vector.broadcast %cst_23 : f32 to vector<16x8xf32>
    %54 = arith.maximumf %52, %53 : vector<16x8xf32>
    %c4_i32 = arith.constant 4 : i32
    %55 = tpu.dynamic_rotate %54 by %c4_i32 dim 0 : vector<16x8xf32>, i32 -> vector<16x8xf32>
    %c4_i32_24 = arith.constant 4 : i32
    %56 = vector.broadcast %c4_i32_24 : i32 to vector<16x1xi32>
    %57 = arith.cmpi sge, %0, %56 : vector<16x1xi32>
    %cst_25 = arith.constant 0.000000e+00 : f32
    %58 = vector.shape_cast %57 : vector<16x1xi1> to vector<16x1xi1>
    %59 = vector.broadcast %58 : vector<16x1xi1> to vector<16x8xi1>
    %60 = vector.broadcast %cst_25 : f32 to vector<16x8xf32>
    %61 = arith.select %59, %55, %60 : vector<16x8xi1>, vector<16x8xf32>
    %c2_i32_26 = arith.constant 2 : i32
    %62 = tpu.dynamic_rotate %54 by %c2_i32_26 dim 0 : vector<16x8xf32>, i32 -> vector<16x8xf32>
    %c2_i32_27 = arith.constant 2 : i32
    %63 = vector.broadcast %c2_i32_27 : i32 to vector<16x1xi32>
    %64 = arith.cmpi sge, %0, %63 : vector<16x1xi32>
    %cst_28 = arith.constant 0.000000e+00 : f32
    %65 = vector.shape_cast %64 : vector<16x1xi1> to vector<16x1xi1>
    %66 = vector.broadcast %65 : vector<16x1xi1> to vector<16x8xi1>
    %67 = vector.broadcast %cst_28 : f32 to vector<16x8xf32>
    %68 = arith.select %66, %62, %67 : vector<16x8xi1>, vector<16x8xf32>
    %69 = tpu.concatenate %61, %68, %54 in 1 : vector<16x8xf32>, vector<16x8xf32>, vector<16x8xf32> -> vector<16x24xf32>
    %c43 = arith.constant 43 : index
    %c0_29 = arith.constant 0 : index
    %70 = vector.load %arg2[%c43, %c0_29] : memref<111x8xf32, #tpu.memory_space<vmem>>, vector<24x8xf32>
    %cst_30 = arith.constant dense<0.000000e+00> : vector<16x8xf32>
    %71 = tpu.matmul %69, %70, %cst_30 {dimension_numbers = #tpu.dot_dimension_numbers<[1], [0], [0], [1], [0, 0, 1, 1], [], []>} : vector<16x24xf32>, vector<24x8xf32>, vector<16x8xf32> -> vector<16x8xf32>
    %c67 = arith.constant 67 : index
    %c0_31 = arith.constant 0 : index
    %72 = vector.load %arg2[%c67, %c0_31] : memref<111x8xf32, #tpu.memory_space<vmem>>, vector<1x8xf32>
    %73 = vector.broadcast %72 : vector<1x8xf32> to vector<16x8xf32>
    %74 = arith.addf %71, %73 : vector<16x8xf32>
    %cst_32 = arith.constant 0.000000e+00 : f32
    %75 = vector.broadcast %cst_32 : f32 to vector<16x8xf32>
    %76 = arith.maximumf %74, %75 : vector<16x8xf32>
    %c4_i32_33 = arith.constant 4 : i32
    %77 = tpu.dynamic_rotate %76 by %c4_i32_33 dim 0 : vector<16x8xf32>, i32 -> vector<16x8xf32>
    %c4_i32_34 = arith.constant 4 : i32
    %78 = vector.broadcast %c4_i32_34 : i32 to vector<16x1xi32>
    %79 = arith.cmpi sge, %0, %78 : vector<16x1xi32>
    %cst_35 = arith.constant 0.000000e+00 : f32
    %80 = vector.shape_cast %79 : vector<16x1xi1> to vector<16x1xi1>
    %81 = vector.broadcast %80 : vector<16x1xi1> to vector<16x8xi1>
    %82 = vector.broadcast %cst_35 : f32 to vector<16x8xf32>
    %83 = arith.select %81, %77, %82 : vector<16x8xi1>, vector<16x8xf32>
    %c2_i32_36 = arith.constant 2 : i32
    %84 = tpu.dynamic_rotate %76 by %c2_i32_36 dim 0 : vector<16x8xf32>, i32 -> vector<16x8xf32>
    %c2_i32_37 = arith.constant 2 : i32
    %85 = vector.broadcast %c2_i32_37 : i32 to vector<16x1xi32>
    %86 = arith.cmpi sge, %0, %85 : vector<16x1xi32>
    %cst_38 = arith.constant 0.000000e+00 : f32
    %87 = vector.shape_cast %86 : vector<16x1xi1> to vector<16x1xi1>
    %88 = vector.broadcast %87 : vector<16x1xi1> to vector<16x8xi1>
    %89 = vector.broadcast %cst_38 : f32 to vector<16x8xf32>
    %90 = arith.select %88, %84, %89 : vector<16x8xi1>, vector<16x8xf32>
    %91 = tpu.concatenate %83, %90, %76 in 1 : vector<16x8xf32>, vector<16x8xf32>, vector<16x8xf32> -> vector<16x24xf32>
    %c68 = arith.constant 68 : index
    %c0_39 = arith.constant 0 : index
    %92 = vector.load %arg2[%c68, %c0_39] : memref<111x8xf32, #tpu.memory_space<vmem>>, vector<24x8xf32>
    %cst_40 = arith.constant dense<0.000000e+00> : vector<16x8xf32>
    %93 = tpu.matmul %91, %92, %cst_40 {dimension_numbers = #tpu.dot_dimension_numbers<[1], [0], [0], [1], [0, 0, 1, 1], [], []>} : vector<16x24xf32>, vector<24x8xf32>, vector<16x8xf32> -> vector<16x8xf32>
    %c92 = arith.constant 92 : index
    %c0_41 = arith.constant 0 : index
    %94 = vector.load %arg2[%c92, %c0_41] : memref<111x8xf32, #tpu.memory_space<vmem>>, vector<1x8xf32>
    %95 = vector.broadcast %94 : vector<1x8xf32> to vector<16x8xf32>
    %96 = arith.addf %93, %95 : vector<16x8xf32>
    %cst_42 = arith.constant 0.000000e+00 : f32
    %97 = vector.broadcast %cst_42 : f32 to vector<16x8xf32>
    %98 = arith.maximumf %96, %97 : vector<16x8xf32>
    %99 = arith.addf %98, %54 : vector<16x8xf32>
    %cst_43 = arith.constant 0.000000e+00 : f32
    %100 = vector.broadcast %cst_43 : f32 to vector<16x8xf32>
    %101 = arith.maximumf %99, %100 : vector<16x8xf32>
    %c93 = arith.constant 93 : index
    %c0_44 = arith.constant 0 : index
    %102 = vector.load %arg2[%c93, %c0_44] : memref<111x8xf32, #tpu.memory_space<vmem>>, vector<8x8xf32>
    %cst_45 = arith.constant dense<0.000000e+00> : vector<16x8xf32>
    %103 = tpu.matmul %101, %102, %cst_45 {dimension_numbers = #tpu.dot_dimension_numbers<[1], [0], [0], [1], [0, 0, 1, 1], [], []>} : vector<16x8xf32>, vector<8x8xf32>, vector<16x8xf32> -> vector<16x8xf32>
    %c101 = arith.constant 101 : index
    %c0_46 = arith.constant 0 : index
    %104 = vector.load %arg2[%c101, %c0_46] : memref<111x8xf32, #tpu.memory_space<vmem>>, vector<1x8xf32>
    %105 = vector.broadcast %104 : vector<1x8xf32> to vector<16x8xf32>
    %106 = arith.addf %103, %105 : vector<16x8xf32>
    %cst_47 = arith.constant 0.000000e+00 : f32
    %107 = vector.broadcast %cst_47 : f32 to vector<16x8xf32>
    %108 = arith.cmpf ogt, %106, %107 : vector<16x8xf32>
    %cst_48 = arith.constant 0.00999999977 : f32
    %109 = vector.broadcast %cst_48 : f32 to vector<16x8xf32>
    %110 = arith.mulf %109, %106 : vector<16x8xf32>
    %111 = arith.select %108, %106, %110 : vector<16x8xi1>, vector<16x8xf32>
    %c102 = arith.constant 102 : index
    %c0_49 = arith.constant 0 : index
    %112 = vector.load %arg2[%c102, %c0_49] : memref<111x8xf32, #tpu.memory_space<vmem>>, vector<8x8xf32>
    %cst_50 = arith.constant dense<0.000000e+00> : vector<16x8xf32>
    %113 = tpu.matmul %111, %112, %cst_50 {dimension_numbers = #tpu.dot_dimension_numbers<[1], [0], [0], [1], [0, 0, 1, 1], [], []>} : vector<16x8xf32>, vector<8x8xf32>, vector<16x8xf32> -> vector<16x8xf32>
    %c110 = arith.constant 110 : index
    %c0_51 = arith.constant 0 : index
    %114 = vector.load %arg2[%c110, %c0_51] : memref<111x8xf32, #tpu.memory_space<vmem>>, vector<1x8xf32>
    %115 = vector.broadcast %114 : vector<1x8xf32> to vector<16x8xf32>
    %116 = arith.addf %113, %115 : vector<16x8xf32>
    %c0_52 = arith.constant 0 : index
    %c0_53 = arith.constant 0 : index
    %c0_54 = arith.constant 0 : index
    %117 = vector.load %arg3[%c0_52, %c0_53, %c0_54] : memref<1x16x8xf32, #tpu.memory_space<vmem>>, vector<1x16x8xf32>
    %118 = vector.shape_cast %117 : vector<1x16x8xf32> to vector<16x8xf32>
    %119 = vector.shape_cast %116 : vector<16x8xf32> to vector<1x16x8xf32>
    tpu.vector_store %arg3[%c0_52, %c0_53, %c0_54], %119 {strides = array<i32>} : memref<1x16x8xf32, #tpu.memory_space<vmem>>, vector<1x16x8xf32>,
    return
  }
  func.func @transform_0(%arg0: i32) -> (i32, i32, i32) {
    %c0_i32 = arith.constant 0 : i32
    %c0_i32_0 = arith.constant 0 : i32
    %c0_i32_1 = arith.constant 0 : i32
    return %arg0, %c0_i32, %c0_i32_0 : i32, i32, i32
  }
  func.func @transform_1(%arg0: i32) -> (i32, i32) {
    %c0_i32 = arith.constant 0 : i32
    %c0_i32_0 = arith.constant 0 : i32
    %c0_i32_1 = arith.constant 0 : i32
    return %c0_i32, %c0_i32_0 : i32, i32
  }
  func.func @transform_2(%arg0: i32) -> (i32, i32, i32) {
    %c0_i32 = arith.constant 0 : i32
    %c0_i32_0 = arith.constant 0 : i32
    %c0_i32_1 = arith.constant 0 : i32
    return %arg0, %c0_i32, %c0_i32_0 : i32, i32, i32
  }
}

</mosaic_0001>

<bundles_post_ra>
// kernel: forward.1
= control target key start
LH: loop header
LB: loop body
LE: loop exit
PB: predicated region body
PF: predicated region fallthrough
CT: control target
= control target key end

     0   :  { %s1173_s9 = smov 0   ;;  %s1375_s0 = inlined_call_operand.vmem [shape: f32[2,16,4], index: 0, kind: input, shape index: {}]   ;;  %s1376_s1 = inlined_call_operand.vmem [shape: f32[111,8], index: 1, kind: input, shape index: {}]   ;;  %s1377_s2 = inlined_call_operand.vmem [shape: f32[2,16,8], index: 2, kind: output, shape index: {}]  }
   0x1 LB: > { %s1003_s10 = sadd.s32 4294967295, %s1152_s9   ;;  %p1007_p0 = scmp.ge.s32.totalorder %s1152_s9, 1  ;;  %s1152_s9 = sphi %s1173_s9, %s12_s9  }
   0x2   : > { %p112_p1 = scmp.lt.s32.totalorder %s1152_s9, 3 }
   0x4   : > { %p113_p2 = pnand %p1007_p0, %p112_p1 }
   0x5   : > { %p134_p3 = scmp.lt.s32.totalorder (!%p113_p2), %s1003_s10, 1  ;;  %v144_v0 = vlaneseq (!%p113_p2)  ;;  %v197_v1 = vld [vmem:[%s1376_s1] sm:$0xff] (!%p113_p2)  ;;  %v198_v2 = vld [vmem:[%s1376_s1 + $0x8] sm:$0xf] (!%p113_p2)  ;;  %vm211_vm0 = vcmask (!%p113_p2), 1043456   ;;  %vm1154_vm1 = vmmov (!%p113_p2), 1  }
   0x6   : > { %116 = sbr.rel (%p113_p2) target bundleno = 1829 (0x725), region = 28  ;;  %v1116_v3 = vpack.c.bf16 (!%p113_p2), %v198_v2, %v197_v1  ;;  %vm1117_vm2 = vmpackc.low (!%p113_p2), %vm211_vm0, %vm1154_vm1  ;;  %s1155_s19 = smov (!%p113_p2), 8   ;;  %vm191_vm7 = vcmask (!%p113_p2), 31744   ;;  %vm194_vm8 = vcmask (!%p113_p2), 64512   ;;  %vm204_vm9 = vcmask (!%p113_p2), 97280   ;;  %v325_v25 = vld [vmem:[%s1376_s1 + $0xd] sm:$0xff] (!%p113_p2) }
   0x7   : > { %v1189_v4 = vshrl.u32 (!%p113_p2), %v144_v0, 7  ;;  %s1156_s20 = smov (!%p113_p2), 4   ;;  %v326_v26 = vld [vmem:[%s1376_s1 + $0x15] sm:$0xff] (!%p113_p2)  ;;  %v1012_v28 = vld [vmem:[%s1376_s1 + $0xc] ss:$0 sm:$0xff] (!%p113_p2)  ;;  %v327_v31 = vld [vmem:[%s1376_s1 + $0x1d] sm:$0xff] (!%p113_p2) }
   0x8   : > { %1118 = vmatprep.subr.msk.bf16.mxu0 (!%p113_p2), %vm1117_vm2, %v1116_v3  ;;  %v1122_v27 = vpack.c.bf16 (!%p113_p2), %v326_v26, %v325_v25  ;;  %v417_v30 = vld [vmem:[%s1376_s1 + $0x26] sm:$0xf] (!%p113_p2)  ;;  %s1157_s3 = smov (!%p113_p2), 16   ;;  %vm322_vm10 = vcmask (!%p113_p2), 130048   ;;  %vm333_vm11 = vcmask (!%p113_p2), 195584   ;;  %v548_v59 = vld [vmem:[%s1376_s1 + $0x2b] sm:$0xff] (!%p113_p2) }
   0x9   : > { %1121 = vmatpush3.bf16.msk.msra.mxu0 (!%p113_p2), %vm1117_vm2, %v1116_v3  ;;  %vm164_vm3 = vcmp.lt.s32.totalorder (!%p113_p2), %v1189_v4, 1  ;;  %vm167_vm4 = vcmp.ge.s32.totalorder (!%p113_p2), %v1189_v4, 1  ;;  %vm151_vm5 = vcmp.lt.s32.totalorder (!%p113_p2), %v1189_v4, 2  ;;  %vm154_vm6 = vcmp.ge.s32.totalorder (!%p113_p2), %v1189_v4, 2  ;;  %v1016_v57 = vld [vmem:[%s1376_s1 + $0x25] ss:$0 sm:$0xff] (!%p113_p2) }
   0xa   : > { %1123 = vmatprep.subr.bf16.mxu1 (!%p113_p2), %v1122_v27  ;;  %1083 = vmatprep.subr.msk.mxu0 (!%p113_p2), %vm211_vm0, %v417_v30  ;;  %v1019_v58 = vld [vmem:[%s1376_s1 + $0x2a] ss:$0 sm:$0xff] (!%p113_p2)  ;;  %v549_v60 = vld [vmem:[%s1376_s1 + $0x33] sm:$0xff] (!%p113_p2)  ;;  %vm511_vm12 = vcmp.lt.s32.totalorder (!%p113_p2), %v1189_v4, 4  ;;  %vm514_vm13 = vcmp.ge.s32.totalorder (!%p113_p2), %v1189_v4, 4 }
   0xb   : > { %1125 = vmatpush3.bf16.msra.mxu1 (!%p113_p2), %v1122_v27  ;;  %v1126_v61 = vpack.c.bf16 (!%p113_p2), %v549_v60, %v548_v59  ;;  %v766_v59 = vld [vmem:[%s1376_s1 + $0x5d] sm:$0xff] (!%p113_p2)  ;;  %v1026_v4 = vld [vmem:[%s1376_s1 + $0x5c] ss:$0 sm:$0xff] (!%p113_p2) }
   0xc   : > { %1078 = vmatprep.subr.mxu1 (!%p113_p2), %v327_v31 }
   0xd   : > { %s1379_s10 = smov (!%p134_p3, %s1003_s10), 1 }
   0xe   : > { %s1037_s15 = sshll.u32 %s1379_s10, 4 }
   0xf   : > { %s138_s18 = scalar_lea.vmem %s1375_s0, %s1037_s15  ;;  %1079 = vmatpush3.msra.mxu1 %v327_v31  ;;  %v672_v31 = vld [vmem:[%s1376_s1 + $0x4c] sm:$0xff]  ;;  %s143_s11 = scalar_lea.vmem %s1377_s2, %s1037_s15 }
  0x10   : > { %v147_v5 = vld [vmem:[%s138_s18] sm:$0xff]  ;;  %v148_v6 = vld [vmem:[%s138_s18 + $0x8] sm:$0xff]  ;;  %1127 = vmatprep.subr.bf16.mxu1 %v1126_v61 }
  0x11   : > { %v162_v7 = vrot.slane %v147_v5, 7  ;;  %v163_v8 = vrot.slane %v148_v6, 7  ;;  %185 = vrot.lane.b32.xlu1 %v147_v5, %s1155_s19  ;;  %v150_v12 = vrot.slane %v148_v6, 6  ;;  %v149_v13 = vrot.slane %v147_v5, 6 }
  0x13   : > { %v166_v9 = vsel %vm164_vm3, %v163_v8, %v162_v7  ;;  %v165_v11 = vsel %vm164_vm3, %v162_v7, %v163_v8  ;;  %v153_v14 = vsel %vm151_vm5, %v150_v12, %v149_v13  ;;  %v152_v20 = vsel %vm151_vm5, %v149_v13, %v150_v12  ;;  %v550_v7 = vld [vmem:[%s1376_s1 + $0x3b] sm:$0xff] }
  0x14   : > { %v173_v10 = vsel %vm167_vm4, %v166_v9, 0.0  ;;  %v160_v16 = vsel %vm154_vm6, %v153_v14, 0.0 }
  0x15   : > { %177 = vrot.lane.b32.xlu0 %v173_v10, %s1156_s20  ;;  %187 = vrot.lane.b32.xlu1 %v148_v6, %s1155_s19 }
  0x19   : > { %179 = vrot.lane.b32.xlu0 %v165_v11, %s1156_s20 }
  0x83   : > { %v186_v15 = vpop.permute.xlu1 %185 }
  0x87   : > { %v178_v17 = vpop.permute.xlu0 %177  ;;  %v188_v21 = vpop.permute.xlu1 %187 }
  0x88   : > { %v192_v18 = vsel %vm191_vm7, %v160_v16, %v178_v17 }
  0x89   : > { %v195_v19 = vsel %vm194_vm8, %v192_v18, %v186_v15 }
  0x8a   : > { %1071 = vmatprep.mubr.msk.f32.mxu0 %vm204_vm9, %v195_v19 }
  0x8b   : > { %v180_v22 = vpop.permute.xlu0 %179 }
  0x8c   : > { %v193_v23 = vsel %vm191_vm7, %v152_v20, %v180_v22 }
  0x8d   : > { %v196_v24 = vsel %vm194_vm8, %v193_v23, %v188_v21 }
  0x8e   : > { %1072 = vmatmul.mubr.msk.f32.vlgmr.msra.gmra.mrb[0].mxu0 %vm204_vm9, %v196_v24 }
  0x8f   : > { %1085 = vmatprep.mubr.msk.f32.mxu0 %vm191_vm7, %v147_v5  ;;  %1084 = vmatpush3.msk.msra.mxu0 %vm211_vm0, %v417_v30  ;;  %v671_v30 = vld [vmem:[%s1376_s1 + $0x44] sm:$0xff] }
  0x92   : > { %1086 = vmatmul.mubr.msk.f32.vlgmr.msra.gmra.mrb[2].mxu0 %vm191_vm7, %v148_v6 }
 0x161   : > { %v1073_v29 = vpop.f32.mrb[0].mxu0 }
 0x162   : > { %v287_v32 = vadd.f32 %v1073_v29, %v1012_v28  ;;  %v281_v33 = vpop.f32.mrb[1].mxu0 }
 0x163   : > { %v282_v34 = vadd.f32 %v1012_v28, %v281_v33  ;;  %v1023_v33 = vld [vmem:[%s1376_s1 + $0x43] ss:$0 sm:$0xff] }
 0x164   : > { %v291_v35 = vmax.f32 %v287_v32, 0.0  ;;  %v1130_v32 = vpack.c.bf16 %v672_v31, %v671_v30 }
 0x165   : > { %v290_v36 = vmax.f32 %v282_v34, 0.0  ;;  %v1087_v55 = vpop.f32.mrb[2].mxu0 }
 0x166   : > { %v293_v37 = vrot.slane %v291_v35, 6  ;;  %v299_v38 = vrot.slane %v291_v35, 7  ;;  %v496_v56 = vpop.f32.mrb[3].mxu0  ;;  %v502_v1 = vadd.f32 %v1087_v55, %v1019_v58  ;;  %1131 = vmatprep.subr.bf16.mxu0 %v1130_v32 }
 0x167   : > { %v292_v39 = vrot.slane %v290_v36, 6  ;;  %v298_v40 = vrot.slane %v290_v36, 7  ;;  %v497_v3 = vadd.f32 %v1019_v58, %v496_v56  ;;  %1133 = vmatpush3.bf16.msra.mxu0 %v1130_v32 }
 0x169   : > { %v300_v41 = vsel %vm164_vm3, %v298_v40, %v299_v38  ;;  %v301_v42 = vsel %vm164_vm3, %v299_v38, %v298_v40  ;;  %v294_v43 = vsel %vm151_vm5, %v292_v39, %v293_v37  ;;  %v295_v44 = vsel %vm151_vm5, %v293_v37, %v292_v39 }
 0x16a   : > { %308 = vrot.lane.b32.xlu1 %v300_v41, %s1155_s19  ;;  %v302_v45 = vsel %vm167_vm4, %v301_v42, 0.0  ;;  %v296_v48 = vsel %vm154_vm6, %v295_v44, 0.0 }
 0x16b   : > { %306 = vrot.lane.b32.xlu0 %v302_v45, %s1155_s19 }
 0x16e   : > { %316 = vrot.lane.b32.xlu1 %v291_v35, %s1157_s3  ;;  %v673_v35 = vld [vmem:[%s1376_s1 + $0x54] sm:$0xff] }
 0x16f   : > { %314 = vrot.lane.b32.xlu0 %v290_v36, %s1157_s3  ;;  %1101 = vmatprep.subr.mxu0 %v673_v35 }
 0x170   : > { %1102 = vmatpush3.msra.mxu0 %v673_v35 }
 0x1dc   : > { %v309_v46 = vpop.permute.xlu1 %308 }
 0x1dd   : > { %v307_v47 = vpop.permute.xlu0 %306  ;;  %v321_v52 = vsel %vm194_vm8, %v294_v43, %v309_v46 }
 0x1de   : > { %v320_v50 = vsel %vm194_vm8, %v296_v48, %v307_v47 }
 0x1e0   : > { %v317_v49 = vpop.permute.xlu1 %316 }
 0x1e1   : > { %v315_v51 = vpop.permute.xlu0 %314  ;;  %v324_v54 = vsel %vm322_vm10, %v321_v52, %v317_v49 }
 0x1e2   : > { %v323_v53 = vsel %vm322_vm10, %v320_v50, %v315_v51 }
 0x1e3   : > { %1080 = vmatprep.mubr.msk.f32.mxu1 %vm333_vm11, %v323_v53 }
 0x1e4   : > { %1081 = vmatmul.mubr.msk.f32.vlgmr.msra.gmra.mrb[0].mxu1 %vm333_vm11, %v324_v54 }
 0x1e5   : > { %1129 = vmatpush3.bf16.msra.mxu1 %v1126_v61 }
 0x1e6   : > { %1092 = vmatprep.subr.mxu1 %v550_v7 }
 0x1e9   : > { %1093 = vmatpush3.msra.mxu1 %v550_v7  ;;  %v859_v7 = vld [vmem:[%s1376_s1 + $0x66] sm:$0xff] }
 0x1ea   : > { %1106 = vmatprep.subr.mxu1 %v766_v59  ;;  %1111 = vmatprep.subr.mxu0 %v859_v7 }
 0x2b7   : > { %v1082_v62 = vpop.f32.mrb[0].mxu1 }
 0x2b8   : > { %v412_v63 = vadd.f32 %v1082_v62, %v1016_v57  ;;  %v406_v0 = vpop.f32.mrb[1].mxu1 }
 0x2b9   : > { %v407_v2 = vadd.f32 %v1016_v57, %v406_v0 }
 0x2ba   : > { %v416_v5 = vmax.f32 %v412_v63, 0.0 }
 0x2bb   : > { %v415_v6 = vmax.f32 %v407_v2, 0.0 }
 0x2bc   : > { %v506_v8 = vadd.f32 %v502_v1, %v416_v5 }
 0x2bd   : > { %v505_v9 = vadd.f32 %v497_v3, %v415_v6 }
 0x2be   : > { %v1276_v10 = vmax.f32 %v506_v8, 0.0  ;;  %v1029_v8 = vld [vmem:[%s1376_s1 + $0x65] ss:$0 sm:$0xff] }
 0x2bf   : > { %v1278_v11 = vmax.f32 %v505_v9, 0.0 }
 0x2c0   : > { %v523_v12 = vrot.slane %v1276_v10, 6  ;;  %v510_v17 = vrot.slane %v1276_v10, 4 }
 0x2c1   : > { %v522_v13 = vrot.slane %v1278_v11, 6  ;;  %v509_v18 = vrot.slane %v1278_v11, 4 }
 0x2c3   : > { %v524_v14 = vsel %vm151_vm5, %v522_v13, %v523_v12  ;;  %v525_v15 = vsel %vm151_vm5, %v523_v12, %v522_v13  ;;  %v513_v21 = vsel %vm511_vm12, %v510_v17, %v509_v18  ;;  %v512_v24 = vsel %vm511_vm12, %v509_v18, %v510_v17  ;;  %v1032_v17 = vld [vmem:[%s1376_s1 + $0x6e] ss:$0 sm:$0xff] }
 0x2c4   : > { %532 = vrot.lane.b32.xlu1 %v524_v14, %s1155_s19  ;;  %v526_v16 = vsel %vm154_vm6, %v525_v15, 0.0  ;;  %v520_v22 = vsel %vm514_vm13, %v513_v21, 0.0 }
 0x2c5   : > { %530 = vrot.lane.b32.xlu0 %v526_v16, %s1155_s19 }
 0x2c8   : > { %540 = vrot.lane.b32.xlu1 %v1276_v10, %s1157_s3 }
 0x2c9   : > { %538 = vrot.lane.b32.xlu0 %v1278_v11, %s1157_s3 }
 0x336   : > { %v533_v19 = vpop.permute.xlu1 %532 }
 0x337   : > { %v531_v20 = vpop.permute.xlu0 %530  ;;  %v545_v27 = vsel %vm194_vm8, %v512_v24, %v533_v19 }
 0x338   : > { %v544_v25 = vsel %vm194_vm8, %v520_v22, %v531_v20 }
 0x33a   : > { %v541_v23 = vpop.permute.xlu1 %540 }
 0x33b   : > { %v539_v26 = vpop.permute.xlu0 %538  ;;  %v547_v29 = vsel %vm322_vm10, %v545_v27, %v541_v23 }
 0x33c   : > { %v546_v28 = vsel %vm322_vm10, %v544_v25, %v539_v26 }
 0x33d   : > { %1094 = vmatprep.mubr.msk.f32.mxu1 %vm333_vm11, %v546_v28 }
 0x33e   : > { %1095 = vmatmul.mubr.msk.f32.vlgmr.msra.gmra.mrb[2].mxu1 %vm333_vm11, %v547_v29 }
 0x33f   : > { %1107 = vmatpush3.msra.mxu1 %v766_v59 }
 0x411   : > { %v1096_v34 = vpop.f32.mrb[2].mxu1 }
 0x412   : > { %v634_v36 = vadd.f32 %v1096_v34, %v1023_v33  ;;  %v628_v37 = vpop.f32.mrb[3].mxu1 }
 0x413   : > { %v629_v38 = vadd.f32 %v1023_v33, %v628_v37 }
 0x414   : > { %v638_v39 = vmax.f32 %v634_v36, 0.0 }
 0x415   : > { %v637_v40 = vmax.f32 %v629_v38, 0.0 }
 0x416   : > { %v640_v41 = vrot.slane %v638_v39, 4  ;;  %v646_v42 = vrot.slane %v638_v39, 6 }
 0x417   : > { %v639_v43 = vrot.slane %v637_v40, 4  ;;  %v645_v44 = vrot.slane %v637_v40, 6 }
 0x419   : > { %v647_v45 = vsel %vm151_vm5, %v645_v44, %v646_v42  ;;  %v648_v46 = vsel %vm151_vm5, %v646_v42, %v645_v44  ;;  %v641_v47 = vsel %vm511_vm12, %v639_v43, %v640_v41  ;;  %v642_v48 = vsel %vm511_vm12, %v640_v41, %v639_v43 }
 0x41a   : > { %655 = vrot.lane.b32.xlu1 %v647_v45, %s1155_s19  ;;  %v649_v49 = vsel %vm154_vm6, %v648_v46, 0.0  ;;  %v643_v52 = vsel %vm514_vm13, %v642_v48, 0.0 }
 0x41b   : > { %653 = vrot.lane.b32.xlu0 %v649_v49, %s1155_s19 }
 0x41e   : > { %663 = vrot.lane.b32.xlu1 %v638_v39, %s1157_s3 }
 0x41f   : > { %661 = vrot.lane.b32.xlu0 %v637_v40, %s1157_s3 }
 0x48c   : > { %v656_v50 = vpop.permute.xlu1 %655 }
 0x48d   : > { %v654_v51 = vpop.permute.xlu0 %653  ;;  %v668_v56 = vsel %vm194_vm8, %v641_v47, %v656_v50 }
 0x48e   : > { %v667_v54 = vsel %vm194_vm8, %v643_v52, %v654_v51 }
 0x490   : > { %v664_v53 = vpop.permute.xlu1 %663 }
 0x491   : > { %v662_v55 = vpop.permute.xlu0 %661  ;;  %v670_v58 = vsel %vm322_vm10, %v668_v56, %v664_v53 }
 0x492   : > { %v669_v57 = vsel %vm322_vm10, %v667_v54, %v662_v55 }
 0x493   : > { %1103 = vmatprep.mubr.msk.f32.mxu0 %vm333_vm11, %v669_v57 }
 0x494   : > { %1104 = vmatmul.mubr.msk.f32.vlgmr.msra.gmra.mrb[4].mxu0 %vm333_vm11, %v670_v58 }
 0x495   : > { %1112 = vmatpush3.msra.mxu0 %v859_v7 }
 0x567   : > { %v1105_v60 = vpop.f32.mrb[4].mxu0 }
 0x568   : > { %v757_v61 = vadd.f32 %v1105_v60, %v1026_v4  ;;  %v751_v62 = vpop.f32.mrb[5].mxu0 }
 0x569   : > { %v752_v63 = vadd.f32 %v1026_v4, %v751_v62 }
 0x56a   : > { %v761_v0 = vmax.f32 %v757_v61, 0.0 }
 0x56b   : > { %v760_v1 = vmax.f32 %v752_v63, 0.0 }
 0x56c   : > { %v763_v2 = vadd.f32 %v761_v0, %v1276_v10 }
 0x56d   : > { %v762_v3 = vadd.f32 %v760_v1, %v1278_v11 }
 0x56e   : > { %v765_v6 = vmax.f32 %v763_v2, 0.0 }
 0x56f   : > { %v764_v5 = vmax.f32 %v762_v3, 0.0 }
 0x571   : > { %1108 = vmatprep.mubr.msk.f32.mxu1 %vm194_vm8, %v764_v5 }
 0x572   : > { %1109 = vmatmul.mubr.msk.f32.vlgmr.msra.gmra.mrb[4].mxu1 %vm194_vm8, %v765_v6 }
 0x645   : > { %v1110_v9 = vpop.f32.mrb[4].mxu1 }
 0x646   : > { %v850_v10 = vadd.f32 %v1110_v9, %v1029_v8  ;;  %v844_v11 = vpop.f32.mrb[5].mxu1 }
 0x647   : > { %v845_v12 = vadd.f32 %v1029_v8, %v844_v11 }
 0x648   : > { %v856_v13 = vmul.f32 0.01, %v850_v10  ;;  %vm854_vm14 = vcmp.gt.f32.partialorder %v850_v10, 0.0 }
 0x649   : > { %vm853_vm15 = vcmp.gt.f32.partialorder %v845_v12, 0.0  ;;  %v855_v14 = vmul.f32 0.01, %v845_v12 }
 0x64a   : > { %v858_v16 = vsel %vm854_vm14, %v850_v10, %v856_v13 }
 0x64b   : > { %v857_v15 = vsel %vm853_vm15, %v845_v12, %v855_v14 }
 0x64c   : > { %1113 = vmatprep.mubr.msk.f32.mxu0 %vm194_vm8, %v857_v15 }
 0x64d   : > { %1114 = vmatmul.mubr.msk.f32.vlgmr.msra.gmra.mrb[6].mxu0 %vm194_vm8, %v858_v16 }
 0x720   : > { %v1115_v18 = vpop.f32.mrb[6].mxu0 }
 0x721   : > { %v943_v19 = vadd.f32 %v1115_v18, %v1032_v17  ;;  %v937_v20 = vpop.f32.mrb[7].mxu0 }
 0x722   : > { %v938_v21 = vadd.f32 %v1032_v17, %v937_v20 }
 0x723   : > { %947 = vst.msk [vmem:[%s143_s11 + $0x8] sm:$0xff] %vm194_vm8, %v943_v19 }
 0x724   : > { %946 = vst.msk [vmem:[%s143_s11] sm:$0xff] %vm194_vm8, %v938_v21 }
 0x725 PF: > { %s12_s9 = sadd.s32 1, %s1152_s9  }
 0x726   : > { %p9_p4 = scmp.ge.s32.totalorder %s12_s9, 4  }
 0x728   :  { %11 = sbr.rel (!%p9_p4) target bundleno = 1 (0x1), region = 58 }

</bundles_post_ra>
